<compile_context>
chip_gen: v6e
topology: v6e:2x2x1
jax: 0.10.0
libtpu: 0.0.40
codegen_flags: <defaults>
</compile_context>

<pallas_src>
import jax
import jax.numpy as jnp
from jax.experimental import pallas as pl
from jax.experimental.pallas import tpu as pltpu

# ---- fixed fake-quant parameters (synthetic QuantStub calibration) ----------
_Q_SCALE = 0.02
_Q_INV_SCALE = 1.0 / _Q_SCALE
_Q_ZERO = 0.0

# ---- lane-dense padded dims --------------------------------------------------
_K_PAD = 128    # padded concat feature dim (Dv + Da + Dt <= 128)
_H3_PAD = 128   # padded hidden concat dim (3*H <= 128)
_C_PAD = 128    # padded class dim (C <= 128)


def _fake_quant(x):
    # quantize-dequantize on an int8 grid (per-tensor affine); multiply by the
    # precomputed reciprocal scale instead of dividing (VPU-only path).
    q = jnp.clip(jnp.round(x * _Q_INV_SCALE) + _Q_ZERO, -128.0, 127.0)
    return (q - _Q_ZERO) * _Q_SCALE


def _mm_kernel(video_ref, audio_ref, text_ref,
               w1_ref, b1_ref, w2_ref, b2_ref,
               out_ref):
    # QuantStub on video / audio (elementwise fake quantization); text untouched.
    video = _fake_quant(video_ref[...].astype(jnp.float32))   # [Bb, T, Dv]
    audio = _fake_quant(audio_ref[...].astype(jnp.float32))   # [Bb, Da]
    text = text_ref[...].astype(jnp.float32)                  # [Bb, S, Dt]

    # temporal pooling as plain sums; the 1/T and 1/S scales are folded into W1.
    v_sum = jnp.sum(video, axis=1)                            # [Bb, Dv]
    t_sum = jnp.sum(text, axis=1)                             # [Bb, Dt]

    bb = v_sum.shape[0]
    k_used = v_sum.shape[1] + audio.shape[1] + t_sum.shape[1]
    pieces = [v_sum, audio, t_sum]
    if _K_PAD > k_used:
        pieces.append(jnp.zeros((bb, _K_PAD - k_used), jnp.float32))
    x = jnp.concatenate(pieces, axis=-1)                      # [Bb, 128] lane-dense

    # single block-diagonal encoder matmul (== concat(hv, ha, ht) padded) + ReLU
    h = jnp.maximum(
        jnp.dot(x, w1_ref[...], preferred_element_type=jnp.float32)
        + b1_ref[...], 0.0)                                   # [Bb, 128]

    # single fusion matmul; DeQuantStub on float output is identity.
    out_ref[...] = (
        jnp.dot(h, w2_ref[...], preferred_element_type=jnp.float32)
        + b2_ref[...])                                        # [Bb, 128]


def _pack_params(params, t_len, s_len):
    """Pack per-modality weights into lane-dense block-diagonal matrices."""
    dv, h = params["wv"].shape
    da = params["wa"].shape[0]
    dt = params["wt"].shape[0]
    c = params["bf"].shape[-1]
    k = dv + da + dt
    h3 = 3 * h
    assert k <= _K_PAD and h3 <= _H3_PAD and c <= _C_PAD

    w1 = jnp.zeros((_K_PAD, _H3_PAD), jnp.float32)
    w1 = w1.at[0:dv, 0:h].set(params["wv"] * (1.0 / t_len))        # fold mean(1/T)
    w1 = w1.at[dv:dv + da, h:2 * h].set(params["wa"])
    w1 = w1.at[dv + da:k, 2 * h:h3].set(params["wt"] * (1.0 / s_len))  # fold mean(1/S)

    b1 = jnp.zeros((1, _H3_PAD), jnp.float32)
    b1 = b1.at[:, 0:h].set(params["bv"])
    b1 = b1.at[:, h:2 * h].set(params["ba"])
    b1 = b1.at[:, 2 * h:h3].set(params["bt"])

    w2 = jnp.zeros((_H3_PAD, _C_PAD), jnp.float32)
    w2 = w2.at[0:h, 0:c].set(params["wfv"])
    w2 = w2.at[h:2 * h, 0:c].set(params["wfa"])
    w2 = w2.at[2 * h:h3, 0:c].set(params["wft"])

    b2 = jnp.zeros((1, _C_PAD), jnp.float32)
    b2 = b2.at[:, 0:c].set(params["bf"])
    return w1, b1, w2, b2


def quantized_multimodal_sentiment(video, audio, text, params, *, block_b=8):
    """video: [B,T,Dv] f32, audio: [B,Da] f32, text: [B,S,Dt] f32 -> [B,C] f32."""
    B, T, Dv = video.shape
    Da = audio.shape[1]
    S, Dt = text.shape[1], text.shape[2]
    C = params["bf"].shape[-1]

    w1, b1, w2, b2 = _pack_params(params, T, S)

    # pad batch to a multiple of the batch tile (output tile = full (8,128) vregs)
    B_pad = ((B + block_b - 1) // block_b) * block_b
    if B_pad != B:
        video = jnp.pad(video, ((0, B_pad - B), (0, 0), (0, 0)))
        audio = jnp.pad(audio, ((0, B_pad - B), (0, 0)))
        text = jnp.pad(text, ((0, B_pad - B), (0, 0), (0, 0)))

    grid = (B_pad // block_b,)
    out = pl.pallas_call(
        _mm_kernel,
        out_shape=jax.ShapeDtypeStruct((B_pad, _C_PAD), jnp.float32),
        grid=grid,
        in_specs=[
            pl.BlockSpec((block_b, T, Dv), lambda i: (i, 0, 0)),
            pl.BlockSpec((block_b, Da), lambda i: (i, 0)),
            pl.BlockSpec((block_b, S, Dt), lambda i: (i, 0, 0)),
            # weights / biases: same block every step -> stay VMEM-resident
            pl.BlockSpec((_K_PAD, _H3_PAD), lambda i: (0, 0)),
            pl.BlockSpec((1, _H3_PAD), lambda i: (0, 0)),
            pl.BlockSpec((_H3_PAD, _C_PAD), lambda i: (0, 0)),
            pl.BlockSpec((1, _C_PAD), lambda i: (0, 0)),
        ],
        out_specs=pl.BlockSpec((block_b, _C_PAD), lambda i: (i, 0)),
        compiler_params=pltpu.CompilerParams(
            dimension_semantics=("parallel",)),
    )(video, audio, text, w1, b1, w2, b2)

    # drop batch / class padding (lane-dense store in-kernel, cheap slice here)
    return out[:B, :C]


def init_params(key, dv, da, dt, hidden, num_classes):
    ks = jax.random.split(key, 8)
    s = 0.05
    params = {
        "wv": s * jax.random.normal(ks[0], (dv, hidden), jnp.float32),
        "bv": jnp.zeros((1, hidden), jnp.float32),
        "wa": s * jax.random.normal(ks[1], (da, hidden), jnp.float32),
        "ba": jnp.zeros((1, hidden), jnp.float32),
        "wt": s * jax.random.normal(ks[2], (dt, hidden), jnp.float32),
        "bt": jnp.zeros((1, hidden), jnp.float32),
        # fusion weight for concat([hv, ha, ht]) kept as 3 blocks, packed later
        "wfv": s * jax.random.normal(ks[3], (hidden, num_classes), jnp.float32),
        "wfa": s * jax.random.normal(ks[4], (hidden, num_classes), jnp.float32),
        "wft": s * jax.random.normal(ks[5], (hidden, num_classes), jnp.float32),
        "bf": 0.01 * jax.random.normal(ks[6], (1, num_classes), jnp.float32),
    }
    return params


if __name__ == "__main__":
    # small shapes consistent with the multimodal forward
    B, T, S = 2, 8, 8            # batch, video frames, text tokens
    Dv, Da, Dt = 32, 32, 32      # per-modality feature dims
    H, C = 32, 3                 # hidden dim, sentiment classes

    key = jax.random.PRNGKey(0)
    k_v, k_a, k_t, k_p = jax.random.split(key, 4)

    video = jax.random.normal(k_v, (B, T, Dv), jnp.float32)
    audio = jax.random.normal(k_a, (B, Da), jnp.float32)
    text = jax.random.normal(k_t, (B, S, Dt), jnp.float32)

    params = init_params(k_p, Dv, Da, Dt, H, C)

    out = quantized_multimodal_sentiment(video, audio, text, params)
    out = jax.block_until_ready(out)

    assert out.shape == (B, C) and out.dtype == jnp.float32
    print("KERNEL_OK")
</pallas_src>

<mosaic_0001>
module attributes {stable_mosaic.version = 11 : i64} {
  func.func @_mm_kernel(%arg0: i32, %arg1: memref<8x8x32xf32, #tpu.memory_space<vmem>>, %arg2: memref<8x32xf32, #tpu.memory_space<vmem>>, %arg3: memref<8x8x32xf32, #tpu.memory_space<vmem>>, %arg4: memref<128x128xf32, #tpu.memory_space<vmem>>, %arg5: memref<1x128xf32, #tpu.memory_space<vmem>>, %arg6: memref<128x128xf32, #tpu.memory_space<vmem>>, %arg7: memref<1x128xf32, #tpu.memory_space<vmem>>, %arg8: memref<8x128xf32, #tpu.memory_space<vmem>>) attributes {dimension_semantics = [#tpu.dimension_semantics<parallel>], iteration_bounds = array<i64: 1>, scalar_prefetch = 0 : i64, scratch_operands = 0 : i64, tpu.core_type = #tpu.core_type<tc>, window_params = [{transform_indices = @transform_0, window_bounds = array<i64: 8, 8, 32>}, {transform_indices = @transform_1, window_bounds = array<i64: 8, 32>}, {transform_indices = @transform_2, window_bounds = array<i64: 8, 8, 32>}, {pipeline_mode = #tpu.pipeline_mode<synchronous>, transform_indices = @transform_3, window_bounds = array<i64: 128, 128>}, {pipeline_mode = #tpu.pipeline_mode<synchronous>, transform_indices = @transform_4, window_bounds = array<i64: 1, 128>}, {pipeline_mode = #tpu.pipeline_mode<synchronous>, transform_indices = @transform_5, window_bounds = array<i64: 128, 128>}, {pipeline_mode = #tpu.pipeline_mode<synchronous>, transform_indices = @transform_6, window_bounds = array<i64: 1, 128>}, {transform_indices = @transform_7, window_bounds = array<i64: 8, 128>}]} {
    %c0 = arith.constant 0 : index
    %c0_0 = arith.constant 0 : index
    %c0_1 = arith.constant 0 : index
    %0 = vector.load %arg1[%c0, %c0_0, %c0_1] : memref<8x8x32xf32, #tpu.memory_space<vmem>>, vector<8x8x32xf32>
    %cst = arith.constant 5.000000e+01 : f32
    %1 = vector.broadcast %cst : f32 to vector<8x8x32xf32>
    %2 = arith.mulf %0, %1 : vector<8x8x32xf32>
    %3 = math.roundeven %2 : vector<8x8x32xf32>
    %cst_2 = arith.constant 0.000000e+00 : f32
    %4 = vector.broadcast %cst_2 : f32 to vector<8x8x32xf32>
    %5 = arith.addf %3, %4 : vector<8x8x32xf32>
    %cst_3 = arith.constant -1.280000e+02 : f32
    %cst_4 = arith.constant 1.270000e+02 : f32
    %6 = vector.broadcast %cst_3 : f32 to vector<8x8x32xf32>
    %7 = arith.maximumf %6, %5 : vector<8x8x32xf32>
    %8 = vector.broadcast %cst_4 : f32 to vector<8x8x32xf32>
    %9 = arith.minimumf %8, %7 : vector<8x8x32xf32>
    %cst_5 = arith.constant 0.000000e+00 : f32
    %10 = vector.broadcast %cst_5 : f32 to vector<8x8x32xf32>
    %11 = arith.subf %9, %10 : vector<8x8x32xf32>
    %cst_6 = arith.constant 2.000000e-02 : f32
    %12 = vector.broadcast %cst_6 : f32 to vector<8x8x32xf32>
    %13 = arith.mulf %11, %12 : vector<8x8x32xf32>
    %c0_7 = arith.constant 0 : index
    %c0_8 = arith.constant 0 : index
    %14 = vector.load %arg2[%c0_7, %c0_8] : memref<8x32xf32, #tpu.memory_space<vmem>>, vector<8x32xf32>
    %cst_9 = arith.constant 5.000000e+01 : f32
    %15 = vector.broadcast %cst_9 : f32 to vector<8x32xf32>
    %16 = arith.mulf %14, %15 : vector<8x32xf32>
    %17 = math.roundeven %16 : vector<8x32xf32>
    %cst_10 = arith.constant 0.000000e+00 : f32
    %18 = vector.broadcast %cst_10 : f32 to vector<8x32xf32>
    %19 = arith.addf %17, %18 : vector<8x32xf32>
    %cst_11 = arith.constant -1.280000e+02 : f32
    %cst_12 = arith.constant 1.270000e+02 : f32
    %20 = vector.broadcast %cst_11 : f32 to vector<8x32xf32>
    %21 = arith.maximumf %20, %19 : vector<8x32xf32>
    %22 = vector.broadcast %cst_12 : f32 to vector<8x32xf32>
    %23 = arith.minimumf %22, %21 : vector<8x32xf32>
    %cst_13 = arith.constant 0.000000e+00 : f32
    %24 = vector.broadcast %cst_13 : f32 to vector<8x32xf32>
    %25 = arith.subf %23, %24 : vector<8x32xf32>
    %cst_14 = arith.constant 2.000000e-02 : f32
    %26 = vector.broadcast %cst_14 : f32 to vector<8x32xf32>
    %27 = arith.mulf %25, %26 : vector<8x32xf32>
    %c0_15 = arith.constant 0 : index
    %c0_16 = arith.constant 0 : index
    %c0_17 = arith.constant 0 : index
    %28 = vector.load %arg3[%c0_15, %c0_16, %c0_17] : memref<8x8x32xf32, #tpu.memory_space<vmem>>, vector<8x8x32xf32>
    %cst_18 = arith.constant dense<0.000000e+00> : vector<8x32xf32>
    %29 = vector.multi_reduction <add>, %13, %cst_18 [1] : vector<8x8x32xf32> to vector<8x32xf32>
    %cst_19 = arith.constant dense<0.000000e+00> : vector<8x32xf32>
    %30 = vector.multi_reduction <add>, %28, %cst_19 [1] : vector<8x8x32xf32> to vector<8x32xf32>
    %cst_20 = arith.constant 0.000000e+00 : f32
    %31 = vector.broadcast %cst_20 : f32 to vector<8x32xf32>
    %32 = tpu.concatenate %29, %27, %30, %31 in 1 : vector<8x32xf32>, vector<8x32xf32>, vector<8x32xf32>, vector<8x32xf32> -> vector<8x128xf32>
    %c0_21 = arith.constant 0 : index
    %c0_22 = arith.constant 0 : index
    %33 = vector.load %arg4[%c0_21, %c0_22] : memref<128x128xf32, #tpu.memory_space<vmem>>, vector<128x128xf32>
    %cst_23 = arith.constant dense<0.000000e+00> : vector<8x128xf32>
    %34 = tpu.matmul %32, %33, %cst_23 {dimension_numbers = #tpu.dot_dimension_numbers<[1], [0], [0], [1], [0, 0, 1, 1], [], []>} : vector<8x128xf32>, vector<128x128xf32>, vector<8x128xf32> -> vector<8x128xf32>
    %c0_24 = arith.constant 0 : index
    %c0_25 = arith.constant 0 : index
    %35 = vector.load %arg5[%c0_24, %c0_25] : memref<1x128xf32, #tpu.memory_space<vmem>>, vector<1x128xf32>
    %36 = vector.broadcast %35 : vector<1x128xf32> to vector<8x128xf32>
    %37 = arith.addf %34, %36 : vector<8x128xf32>
    %cst_26 = arith.constant 0.000000e+00 : f32
    %38 = vector.broadcast %cst_26 : f32 to vector<8x128xf32>
    %39 = arith.maximumf %37, %38 : vector<8x128xf32>
    %c0_27 = arith.constant 0 : index
    %c0_28 = arith.constant 0 : index
    %40 = vector.load %arg6[%c0_27, %c0_28] : memref<128x128xf32, #tpu.memory_space<vmem>>, vector<128x128xf32>
    %cst_29 = arith.constant dense<0.000000e+00> : vector<8x128xf32>
    %41 = tpu.matmul %39, %40, %cst_29 {dimension_numbers = #tpu.dot_dimension_numbers<[1], [0], [0], [1], [0, 0, 1, 1], [], []>} : vector<8x128xf32>, vector<128x128xf32>, vector<8x128xf32> -> vector<8x128xf32>
    %c0_30 = arith.constant 0 : index
    %c0_31 = arith.constant 0 : index
    %42 = vector.load %arg7[%c0_30, %c0_31] : memref<1x128xf32, #tpu.memory_space<vmem>>, vector<1x128xf32>
    %43 = vector.broadcast %42 : vector<1x128xf32> to vector<8x128xf32>
    %44 = arith.addf %41, %43 : vector<8x128xf32>
    %c0_32 = arith.constant 0 : index
    %c0_33 = arith.constant 0 : index
    %45 = vector.load %arg8[%c0_32, %c0_33] : memref<8x128xf32, #tpu.memory_space<vmem>>, vector<8x128xf32>
    tpu.vector_store %arg8[%c0_32, %c0_33], %44 {strides = array<i32>} : memref<8x128xf32, #tpu.memory_space<vmem>>, vector<8x128xf32>,
    return
  }
  func.func @transform_0(%arg0: i32) -> (i32, i32, i32) {
    %c0_i32 = arith.constant 0 : i32
    %c0_i32_0 = arith.constant 0 : i32
    %c0_i32_1 = arith.constant 0 : i32
    return %arg0, %c0_i32, %c0_i32_0 : i32, i32, i32
  }
  func.func @transform_1(%arg0: i32) -> (i32, i32) {
    %c0_i32 = arith.constant 0 : i32
    %c0_i32_0 = arith.constant 0 : i32
    return %arg0, %c0_i32 : i32, i32
  }
  func.func @transform_2(%arg0: i32) -> (i32, i32, i32) {
    %c0_i32 = arith.constant 0 : i32
    %c0_i32_0 = arith.constant 0 : i32
    %c0_i32_1 = arith.constant 0 : i32
    return %arg0, %c0_i32, %c0_i32_0 : i32, i32, i32
  }
  func.func @transform_3(%arg0: i32) -> (i32, i32) {
    %c0_i32 = arith.constant 0 : i32
    %c0_i32_0 = arith.constant 0 : i32
    %c0_i32_1 = arith.constant 0 : i32
    return %c0_i32, %c0_i32_0 : i32, i32
  }
  func.func @transform_4(%arg0: i32) -> (i32, i32) {
    %c0_i32 = arith.constant 0 : i32
    %c0_i32_0 = arith.constant 0 : i32
    %c0_i32_1 = arith.constant 0 : i32
    return %c0_i32, %c0_i32_0 : i32, i32
  }
  func.func @transform_5(%arg0: i32) -> (i32, i32) {
    %c0_i32 = arith.constant 0 : i32
    %c0_i32_0 = arith.constant 0 : i32
    %c0_i32_1 = arith.constant 0 : i32
    return %c0_i32, %c0_i32_0 : i32, i32
  }
  func.func @transform_6(%arg0: i32) -> (i32, i32) {
    %c0_i32 = arith.constant 0 : i32
    %c0_i32_0 = arith.constant 0 : i32
    %c0_i32_1 = arith.constant 0 : i32
    return %c0_i32, %c0_i32_0 : i32, i32
  }
  func.func @transform_7(%arg0: i32) -> (i32, i32) {
    %c0_i32 = arith.constant 0 : i32
    %c0_i32_0 = arith.constant 0 : i32
    return %arg0, %c0_i32 : i32, i32
  }
}

</mosaic_0001>

<bundles_post_ra>
// kernel: tpu_custom_call.1
= control target key start
LH: loop header
LB: loop body
LE: loop exit
PB: predicated region body
PF: predicated region fallthrough
CT: control target
= control target key end

     0   :  { %12 = vsyncpa [#allocation3], 0  ;;  %s1112_s0 = inlined_call_operand.hbm [shape: f32[8,8,32], index: 0, kind: input, shape index: {}]   ;;  %s1113_s1 = inlined_call_operand.hbm [shape: f32[8,32], index: 1, kind: input, shape index: {}]   ;;  %s1114_s2 = inlined_call_operand.hbm [shape: f32[8,8,32], index: 2, kind: input, shape index: {}]   ;;  %s1115_s3 = inlined_call_operand.hbm [shape: f32[128,128], index: 3, kind: input, shape index: {}]   ;;  %s1116_s4 = inlined_call_operand.vmem [shape: f32[1,128], index: 4, kind: input, shape index: {}]   ;;  %s1117_s5 = inlined_call_operand.hbm [shape: f32[128,128], index: 5, kind: input, shape index: {}]   ;;  %s1118_s6 = inlined_call_operand.vmem [shape: f32[1,128], index: 6, kind: input, shape index: {}]   ;;  %s1119_s7 = inlined_call_operand.hbm [shape: f32[8,128], index: 7, kind: output, shape index: {}]  }
   0x1   :  { %13 = vsyncpa [#allocation6], 0 }
   0x2   :  { %14 = vsyncpa [#allocation9], 0 }
   0x3   :  { %15 = vsyncpa [#allocation4], 0  ;;  %s851_s24 = smov [#allocation5]  }
   0x4   :  { %s34_s25 = sshll.u32 %s851_s24, 4  ;;  %s35_s25 = int_to_ptr.vmem [resolvable:$true] %s34_s25 }
   0x5   :  { %s731_s26 = scalar_lea.vmem %s35_s25, 128  ;;  %p736_p1 = scmp.lt.s32.totalorder %s35_s25, %s35_s25 }
   0x6   :  { %p732_p0 = scmp.ne.s32.totalorder %s35_s25, %s731_s26  ;;  %p737_p2 = scmp.lt.s32.totalorder %s731_s26, %s731_s26 }
   0x8   :  { %p738_p3 = por %p737_p2, %p736_p1 }
   0xa   :  { %p739_p4 = pnand %p738_p3, %p732_p0 }
   0xc   :  { %742 = shalt.err (!%p739_p4)
}
   0xd   :  { %37 = dma.hbm_to_vmem [thread:$0]  %s1113_s1, 128, %s35_s25, [#allocation6]  }
   0xe   :  { %s852_s29 = smov [#allocation8]   ;;  %s853_s8 = smov [#allocation2]  }
   0xf   :  { %s55_s30 = sshll.u32 %s852_s29, 4  ;;  %s21_s9 = sshll.u32 %s853_s8, 4  ;;  %s56_s30 = int_to_ptr.vmem [resolvable:$true] %s55_s30  ;;  %s22_s9 = int_to_ptr.vmem [resolvable:$true] %s21_s9 }
  0x10   :  { %s751_s10 = scalar_lea.vmem %s56_s30, 2048  ;;  %p756_p6 = scmp.lt.s32.totalorder %s56_s30, %s56_s30 }
  0x11   :  { %p752_p5 = scmp.ne.s32.totalorder %s56_s30, %s751_s10  ;;  %p757_p7 = scmp.lt.s32.totalorder %s751_s10, %s751_s10 }
  0x13   :  { %p758_p8 = por %p757_p7, %p756_p6 }
  0x15   :  { %p759_p9 = pnand %p758_p8, %p752_p5 }
  0x17   :  { %762 = shalt.err (!%p759_p9)
}
  0x18   :  { %s854_s11 = smov 128   ;;  %s855_s12 = smov 8  }
  0x19   :  { %61 = dma.hbm_to_vmem [thread:$0]  %s1115_s3, 2048, %s56_s30, [#allocation9], %s854_s11, %s854_s11, %s855_s12  }
  0x1a   :  { %s771_s1 = scalar_lea.vmem %s22_s9, 1024  ;;  %p776_p11 = scmp.lt.s32.totalorder %s22_s9, %s22_s9 }
  0x1b   :  { %p772_p10 = scmp.ne.s32.totalorder %s22_s9, %s771_s1  ;;  %p777_p12 = scmp.lt.s32.totalorder %s771_s1, %s771_s1 }
  0x1d   :  { %p778_p13 = por %p777_p12, %p776_p11 }
  0x1f   :  { %p779_p0 = pnand %p778_p13, %p772_p10 }
  0x21   :  { %782 = shalt.err (!%p779_p0)
}
  0x22   :  { %27 = dma.hbm_to_vmem [thread:$0]  %s1112_s0, 1024, %s22_s9, [#allocation3], %s854_s11, %s854_s11, %s855_s12  }
  0x23   :  { %s856_s17 = smov [#allocation7]   ;;  %s857_s19 = smov [#allocation10]  }
  0x24   :  { %s43_s18 = sshll.u32 %s856_s17, 4  ;;  %s69_s3 = sshll.u32 %s857_s19, 4  ;;  %s44_s18 = int_to_ptr.vmem [resolvable:$true] %s43_s18  ;;  %s70_s3 = int_to_ptr.vmem [resolvable:$true] %s69_s3 }
  0x25   :  { %s791_s20 = scalar_lea.vmem %s44_s18, 1024  ;;  %p796_p2 = scmp.lt.s32.totalorder %s44_s18, %s44_s18 }
  0x26   :  { %p792_p1 = scmp.ne.s32.totalorder %s44_s18, %s791_s20  ;;  %p797_p3 = scmp.lt.s32.totalorder %s791_s20, %s791_s20 }
  0x28   :  { %p798_p4 = por %p797_p3, %p796_p2 }
  0x2a   :  { %p799_p5 = pnand %p798_p4, %p792_p1 }
  0x2c   :  { %802 = shalt.err (!%p799_p5)
}
  0x2d   :  { %49 = dma.hbm_to_vmem [thread:$0]  %s1114_s2, 1024, %s44_s18, [#allocation6], %s854_s11, %s854_s11, %s855_s12  }
  0x2e   :  { %s811_s0 = scalar_lea.vmem %s70_s3, 2048  ;;  %p816_p7 = scmp.lt.s32.totalorder %s70_s3, %s70_s3 }
  0x2f   :  { %p812_p6 = scmp.ne.s32.totalorder %s70_s3, %s811_s0  ;;  %p817_p8 = scmp.lt.s32.totalorder %s811_s0, %s811_s0 }
  0x31   :  { %p818_p9 = por %p817_p8, %p816_p7 }
  0x33   :  { %p819_p10 = pnand %p818_p9, %p812_p6 }
  0x35   :  { %822 = shalt.err (!%p819_p10)
}
  0x36   :  { %75 = dma.hbm_to_vmem [thread:$0]  %s1117_s5, 2048, %s70_s3, [#allocation9], %s854_s11, %s854_s11, %s855_s12  }
  0x37   :  { %843 = dma.done.wait [#allocation3], 1024  }
  0x38   :  { %844 = vsyncadd [#allocation3], 4294966272 }
  0x39   :  { %845 = dma.done.wait [#allocation6], 1152  }
  0x3a   :  { %846 = vsyncadd [#allocation6], 4294966144 }
  0x3b   :  { %847 = dma.done.wait [#allocation9], 4096  }
  0x3c   :  { %848 = vsyncadd [#allocation9], 4294963200  ;;  %v858_v0 = vmov 0.0   ;;  %vm164_vm0 = vcmask 261120   ;;  %v149_v1 = vld [vmem:[#allocation5] sm:$0xff]  ;;  %v156_v2 = vld [vmem:[#allocation7] sm:$0xff] }
  0x3d   :  { %569 = vmatprep.subr.mxu0 %v858_v0  ;;  %604 = vmatprep.subr.mxu1 %v858_v0  ;;  %v157_v3 = vld [vmem:[#allocation7 + $0x8] sm:$0xff]  ;;  %v932_v4 = vmul.f32 50.0, %v149_v1  ;;  %v158_v5 = vld [vmem:[#allocation7 + $0x10] sm:$0xff]  ;;  %v159_v6 = vld [vmem:[#allocation7 + $0x18] sm:$0xff]  ;;  %v221_v8 = vsel %vm164_vm0, %v156_v2, 0.0  ;;  %vm285_vm1 = vcmask 1041409  }
  0x3e   :  { %v160_v7 = vld [vmem:[#allocation7 + $0x20] sm:$0xff]  ;;  %v228_v9 = vsel %vm164_vm0, %v157_v3, 0.0  ;;  %v161_v10 = vld [vmem:[#allocation7 + $0x28] sm:$0xff]  ;;  %v222_v11 = vrot.slane %v221_v8, 4  ;;  %v235_v13 = vsel %vm164_vm0, %v158_v5, 0.0  ;;  %v342_v18 = vld [vmem:[#allocation8 + $0x78] sm:$0xff] }
  0x3f   :  { %v229_v12 = vrot.slane %v228_v9, 4  ;;  %v703_v14 = vand.u32 2147483647, %v932_v4  ;;  %v705_v15 = vcvt.f32.s32 %v932_v4  ;;  %v708_v16 = vand.u32 2147483648, %v932_v4  ;;  %v341_v19 = vld [vmem:[#allocation8 + $0x70] sm:$0xff]  ;;  %570 = vmatpush3.msra.mxu0 %v342_v18  ;;  %v340_v29 = vld [vmem:[#allocation8 + $0x68] sm:$0xff] }
  0x40   :  { %v236_v17 = vrot.slane %v235_v13, 4  ;;  %v223_v20 = vadd.f32 %v222_v11, %v221_v8  ;;  %v242_v22 = vsel %vm164_vm0, %v159_v6, 0.0  ;;  %v249_v23 = vsel %vm164_vm0, %v160_v7, 0.0  ;;  %v162_v26 = vld [vmem:[#allocation7 + $0x30] sm:$0xff]  ;;  %571 = vmatprep.subr.mxu0 %v858_v0  ;;  %v339_v38 = vld [vmem:[#allocation8 + $0x60] sm:$0xff]  ;;  %v338_v47 = vld [vmem:[#allocation8 + $0x58] sm:$0xff] }
  0x41   :  { %v230_v21 = vadd.f32 %v229_v12, %v228_v9  ;;  %vm942_vm2 = vcmp.lt.f32.partialorder %v703_v14, 8388608.0  ;;  %v706_v25 = vcvt.s32.f32 %v705_v15  ;;  %v243_v28 = vrot.slane %v242_v22, 4  ;;  %572 = vmatpush3.msra.mxu0 %v341_v19  ;;  %v163_v53 = vld [vmem:[#allocation7 + $0x38] sm:$0xff]  ;;  %v337_v57 = vld [vmem:[#allocation8 + $0x50] sm:$0xff]  ;;  %v336_v3 = vld [vmem:[#allocation8 + $0x48] sm:$0xff]  ;;  %s859_s2 = smov 32  }
  0x42   :  { %v237_v27 = vadd.f32 %v236_v17, %v235_v13  ;;  %vm287_vm3 = vcmask 1042434   ;;  %v224_v30 = vrot.slane %v223_v20, 2  ;;  %v250_v32 = vrot.slane %v249_v23, 4  ;;  %573 = vmatprep.subr.mxu0 %v858_v0  ;;  %v335_v9 = vld [vmem:[#allocation8 + $0x40] sm:$0xff]  ;;  %v95_v15 = vld [vmem:[#allocation2 + $0x10] sm:$0xff]  ;;  %s860_s5 = smov 64  }
  0x43   :  { %v231_v31 = vrot.slane %v230_v21, 2  ;;  %v256_v33 = vsel %vm164_vm0, %v161_v10, 0.0  ;;  %vm289_vm4 = vcmask 1043459   ;;  %v707_v34 = vand.u32 2147483647, %v706_v25  ;;  %574 = vmatpush3.msra.mxu0 %v340_v29  ;;  %v94_v14 = vld [vmem:[#allocation2 + $0x8] sm:$0xff] }
  0x44   :  { %v238_v35 = vrot.slane %v237_v27, 2  ;;  %v244_v36 = vadd.f32 %v243_v28, %v242_v22  ;;  %v257_v37 = vrot.slane %v256_v33, 4  ;;  %vm291_vm5 = vcmask 1044484   ;;  %575 = vmatprep.subr.mxu0 %v858_v0  ;;  %v98_v28 = vld [vmem:[#allocation2 + $0x28] sm:$0xff]  ;;  %v99_v29 = vld [vmem:[#allocation2 + $0x30] sm:$0xff]  ;;  %s862_s29 = smov [#allocation11]  }
  0x45   :  { %v225_v39 = vadd.f32 %v224_v30, %v223_v20  ;;  %v232_v40 = vadd.f32 %v231_v31, %v230_v21  ;;  %v251_v41 = vadd.f32 %v250_v32, %v249_v23  ;;  %v263_v42 = vsel %vm164_vm0, %v162_v26, 0.0  ;;  %576 = vmatpush3.msra.mxu0 %v339_v38  ;;  %v334_v20 = vld [vmem:[#allocation8 + $0x38] sm:$0xff]  ;;  %v100_v30 = vld [vmem:[#allocation2 + $0x38] sm:$0xff]  ;;  %s521_s30 = sshll.u32 %s862_s29, 4  ;;  %s522_s30 = int_to_ptr.vmem [resolvable:$true] %s521_s30 }
  0x46   :  { %vm293_vm6 = vcmask 1045509   ;;  %v709_v43 = vor.u32 %v708_v16, %v707_v34  ;;  %v239_v44 = vadd.f32 %v238_v35, %v237_v27  ;;  %v245_v45 = vrot.slane %v244_v36, 2  ;;  %577 = vmatprep.subr.mxu0 %v858_v0  ;;  %v96_v16 = vld [vmem:[#allocation2 + $0x18] sm:$0xff]  ;;  %v97_v21 = vld [vmem:[#allocation2 + $0x20] sm:$0xff]  ;;  %s823_s8 = scalar_lea.vmem %s522_s30, 128  ;;  %p828_p12 = scmp.lt.s32.totalorder %s522_s30, %s522_s30 }
  0x47   :  { %v258_v46 = vadd.f32 %v257_v37, %v256_v33  ;;  %v226_v48 = vrot.slane %v225_v39, 1  ;;  %v233_v49 = vrot.slane %v232_v40, 1  ;;  %v252_v50 = vrot.slane %v251_v41, 2  ;;  %578 = vmatpush3.msra.mxu0 %v338_v47  ;;  %v436_v23 = vld [vmem:[#allocation10 + $0x78] sm:$0xff]  ;;  %v435_v35 = vld [vmem:[#allocation10 + $0x70] sm:$0xff]  ;;  %p824_p11 = scmp.ne.s32.totalorder %s522_s30, %s823_s8  ;;  %p829_p13 = scmp.lt.s32.totalorder %s823_s8, %s823_s8 }
  0x48   :  { %v264_v51 = vrot.slane %v263_v42, 4  ;;  %v710_v52 = vsel %vm942_vm2, %v709_v43, %v932_v4  ;;  %v240_v54 = vrot.slane %v239_v44, 1  ;;  %v246_v55 = vadd.f32 %v245_v45, %v244_v36  ;;  %579 = vmatprep.subr.mxu0 %v858_v0  ;;  %v93_v4 = vld [vmem:[#allocation2] sm:$0xff]  ;;  %605 = vmatpush3.msra.mxu1 %v436_v23  ;;  %v434_v45 = vld [vmem:[#allocation10 + $0x68] sm:$0xff] }
  0x49   :  { %v259_v56 = vrot.slane %v258_v46, 2  ;;  %v153_v58 = vmax.f32 %v710_v52, -128.0  ;;  %v227_v59 = vadd.f32 %v226_v48, %v225_v39  ;;  %v234_v60 = vadd.f32 %v233_v49, %v232_v40  ;;  %580 = vmatpush3.msra.mxu0 %v337_v57  ;;  %v333_v39 = vld [vmem:[#allocation8 + $0x30] sm:$0xff]  ;;  %606 = vmatprep.subr.mxu1 %v858_v0  ;;  %v332_v48 = vld [vmem:[#allocation8 + $0x28] sm:$0xff]  ;;  %p830_p0 = por %p829_p13, %p828_p12 }
  0x4a   :  { %v253_v61 = vadd.f32 %v252_v50, %v251_v41  ;;  %vm295_vm7 = vcmask 1046534   ;;  %v241_v62 = vadd.f32 %v240_v54, %v239_v44  ;;  %v247_v63 = vrot.slane %v246_v55, 1  ;;  %581 = vmatprep.subr.mxu0 %v858_v0  ;;  %607 = vmatpush3.msra.mxu1 %v435_v35 }
  0x4b   :  { %v260_v1 = vadd.f32 %v259_v56, %v258_v46  ;;  %v265_v2 = vadd.f32 %v264_v51, %v263_v42  ;;  %v154_v5 = vmin.f32 %v153_v58, 127.0  ;;  %v270_v7 = vsel %vm164_vm0, %v163_v53, 0.0  ;;  %582 = vmatpush3.msra.mxu0 %v336_v3  ;;  %608 = vmatprep.subr.mxu1 %v858_v0  ;;  %v331_v58 = vld [vmem:[#allocation8 + $0x20] sm:$0xff]  ;;  %p831_p1 = pnand %p830_p0, %p824_p11 }
  0x4c   :  { %v254_v6 = vrot.slane %v253_v61, 1  ;;  %v312_v8 = vsel %vm285_vm1, %v234_v60, %v227_v59  ;;  %v248_v10 = vadd.f32 %v247_v63, %v246_v55  ;;  %v271_v13 = vrot.slane %v270_v7, 4  ;;  %583 = vmatprep.subr.mxu0 %v858_v0  ;;  %v433_v55 = vld [vmem:[#allocation10 + $0x60] sm:$0xff]  ;;  %609 = vmatpush3.msra.mxu1 %v434_v45 }
  0x4d   :  { %v261_v11 = vrot.slane %v260_v1, 1  ;;  %v266_v12 = vrot.slane %v265_v2, 2  ;;  %v155_v17 = vmul.f32 0.02, %v154_v5  ;;  %vm297_vm8 = vcmask 1047559   ;;  %584 = vmatpush3.msra.mxu0 %v335_v9  ;;  %610 = vmatprep.subr.mxu1 %v858_v0 }
  0x4e   :  { %v255_v18 = vadd.f32 %v254_v6, %v253_v61  ;;  %v313_v19 = vsel %vm287_vm3, %v241_v62, %v312_v8  ;;  %v960_v22 = vmul.f32 50.0, %v93_v4  ;;  %v272_v26 = vadd.f32 %v271_v13, %v270_v7  ;;  %585 = vmatprep.subr.mxu0 %v858_v0  ;;  %v330_v4 = vld [vmem:[#allocation8 + $0x18] sm:$0xff]  ;;  %611 = vmatpush3.msra.mxu1 %v433_v55 }
  0x4f   :  { %v262_v24 = vadd.f32 %v261_v11, %v260_v1  ;;  %v267_v25 = vadd.f32 %v266_v12, %v265_v2  ;;  %v314_v27 = vsel %vm289_vm4, %v248_v10, %v313_v19  ;;  %301 = vrot.lane.b32.xlu0 %v155_v17, %s859_s2  ;;  %v965_v32 = vmul.f32 50.0, %v94_v14  ;;  %586 = vmatpush3.msra.mxu0 %v334_v20  ;;  %v432_v2 = vld [vmem:[#allocation10 + $0x58] sm:$0xff]  ;;  %v431_v17 = vld [vmem:[#allocation10 + $0x50] sm:$0xff] }
  0x50   :  { %v315_v31 = vsel %vm291_vm5, %v255_v18, %v314_v27  ;;  %v967_v33 = vmul.f32 50.0, %v95_v15  ;;  %v969_v34 = vmul.f32 50.0, %v96_v16  ;;  %v273_v37 = vrot.slane %v272_v26, 2  ;;  %587 = vmatprep.subr.mxu0 %v858_v0  ;;  %612 = vmatprep.subr.mxu1 %v858_v0  ;;  %v329_v16 = vld [vmem:[#allocation8 + $0x10] sm:$0xff]  ;;  %v328_v27 = vld [vmem:[#allocation8 + $0x8] sm:$0xff] }
  0x51   :  { %v268_v36 = vrot.slane %v267_v25, 1  ;;  %v316_v38 = vsel %vm293_vm6, %v262_v24, %v315_v31  ;;  %v973_v40 = vmul.f32 50.0, %v97_v21  ;;  %v975_v41 = vmul.f32 50.0, %v98_v28  ;;  %588 = vmatpush3.msra.mxu0 %v333_v39  ;;  %613 = vmatpush3.msra.mxu1 %v432_v2  ;;  %v430_v28 = vld [vmem:[#allocation10 + $0x48] sm:$0xff]  ;;  %v327_v39 = vld [vmem:[#allocation8] sm:$0xff] }
  0x52   :  { %v977_v42 = vmul.f32 50.0, %v99_v29  ;;  %v979_v43 = vmul.f32 50.0, %v100_v30  ;;  %v639_v44 = vand.u32 2147483647, %v960_v22  ;;  %v274_v47 = vadd.f32 %v273_v37, %v272_v26  ;;  %589 = vmatprep.subr.mxu0 %v858_v0  ;;  %614 = vmatprep.subr.mxu1 %v858_v0 }
  0x53   :  { %v269_v46 = vadd.f32 %v268_v36, %v267_v25  ;;  %v641_v49 = vcvt.f32.s32 %v960_v22  ;;  %v644_v50 = vand.u32 2147483648, %v960_v22  ;;  %v647_v52 = vand.u32 2147483647, %v965_v32  ;;  %590 = vmatpush3.msra.mxu0 %v332_v48  ;;  %615 = vmatpush3.msra.mxu1 %v431_v17 }
  0x54   :  { %vm986_vm9 = vcmp.lt.f32.partialorder %v639_v44, 8388608.0  ;;  %v649_v53 = vcvt.f32.s32 %v965_v32  ;;  %v652_v54 = vand.u32 2147483648, %v965_v32  ;;  %v275_v56 = vrot.slane %v274_v47, 1  ;;  %591 = vmatprep.subr.mxu0 %v858_v0  ;;  %616 = vmatprep.subr.mxu1 %v858_v0 }
  0x55   :  { %v317_v57 = vsel %vm295_vm7, %v269_v46, %v316_v38  ;;  %v642_v59 = vcvt.s32.f32 %v641_v49  ;;  %v655_v60 = vand.u32 2147483647, %v967_v33  ;;  %vm997_vm10 = vcmp.lt.f32.partialorder %v647_v52, 8388608.0  ;;  %592 = vmatpush3.msra.mxu0 %v331_v58  ;;  %617 = vmatpush3.msra.mxu1 %v430_v28 }
  0x56   :  { %v650_v62 = vcvt.s32.f32 %v649_v53  ;;  %v657_v63 = vcvt.f32.s32 %v967_v33  ;;  %v660_v1 = vand.u32 2147483648, %v967_v33  ;;  %v276_v3 = vadd.f32 %v275_v56, %v274_v47  ;;  %593 = vmatprep.subr.mxu0 %v858_v0  ;;  %618 = vmatprep.subr.mxu1 %v858_v0 }
  0x57   :  { %v643_v5 = vand.u32 2147483647, %v642_v59  ;;  %vm1005_vm11 = vcmp.lt.f32.partialorder %v655_v60, 8388608.0  ;;  %v663_v7 = vand.u32 2147483647, %v969_v34  ;;  %v665_v10 = vcvt.f32.s32 %v969_v34  ;;  %594 = vmatpush3.msra.mxu0 %v330_v4  ;;  %v427_v60 = vld [vmem:[#allocation10 + $0x30] sm:$0xff] }
  0x58   :  { %v651_v8 = vand.u32 2147483647, %v650_v62  ;;  %v658_v9 = vcvt.s32.f32 %v657_v63  ;;  %v668_v11 = vand.u32 2147483648, %v969_v34  ;;  %v318_v12 = vsel %vm297_vm8, %v276_v3, %v317_v57  ;;  %595 = vmatprep.subr.mxu0 %v858_v0 }
  0x59   :  { %v645_v13 = vor.u32 %v644_v50, %v643_v5  ;;  %vm1015_vm12 = vcmp.lt.f32.partialorder %v663_v7, 8388608.0  ;;  %v671_v15 = vand.u32 2147483647, %v973_v40  ;;  %319 = vrot.lane.b32.xlu0 %v318_v12, %s860_s5  ;;  %v666_v20 = vcvt.s32.f32 %v665_v10  ;;  %596 = vmatpush3.msra.mxu0 %v329_v16  ;;  %v426_v5 = vld [vmem:[#allocation10 + $0x28] sm:$0xff] }
  0x5a   :  { %v653_v18 = vor.u32 %v652_v54, %v651_v8  ;;  %v659_v19 = vand.u32 2147483647, %v658_v9  ;;  %v673_v21 = vcvt.f32.s32 %v973_v40  ;;  %v676_v25 = vand.u32 2147483648, %v973_v40  ;;  %597 = vmatprep.subr.mxu0 %v858_v0 }
  0x5b   :  { %v646_v23 = vsel %vm986_vm9, %v645_v13, %v960_v22  ;;  %vm1025_vm13 = vcmp.lt.f32.partialorder %v671_v15, 8388608.0  ;;  %v679_v26 = vand.u32 2147483647, %v975_v41  ;;  %v667_v31 = vand.u32 2147483647, %v666_v20  ;;  %598 = vmatpush3.msra.mxu0 %v328_v27  ;;  %v425_v13 = vld [vmem:[#allocation10 + $0x20] sm:$0xff] }
  0x5c   :  { %v654_v29 = vsel %vm997_vm10, %v653_v18, %v965_v32  ;;  %v661_v30 = vor.u32 %v660_v1, %v659_v19  ;;  %v674_v35 = vcvt.s32.f32 %v673_v21  ;;  %v681_v36 = vcvt.f32.s32 %v975_v41  ;;  %v429_v32 = vld [vmem:[#allocation10 + $0x40] sm:$0xff]  ;;  %599 = vmatprep.subr.mxu0 %v858_v0 }
  0x5d   :  { %vm1035_vm14 = vcmp.lt.f32.partialorder %v679_v26, 8388608.0  ;;  %v684_v37 = vand.u32 2147483648, %v975_v41  ;;  %v687_v38 = vand.u32 2147483647, %v977_v42  ;;  %v669_v45 = vor.u32 %v668_v11, %v667_v31  ;;  %600 = vmatpush3.msra.mxu0 %v327_v39  ;;  %619 = vmatpush3.msra.mxu1 %v429_v32 }
  0x5e   :  { %v662_v44 = vsel %vm1005_vm11, %v661_v30, %v967_v33  ;;  %v675_v46 = vand.u32 2147483647, %v674_v35  ;;  %v689_v47 = vcvt.f32.s32 %v977_v42  ;;  %v682_v48 = vcvt.s32.f32 %v681_v36  ;;  %v428_v33 = vld [vmem:[#allocation10 + $0x38] sm:$0xff]  ;;  %620 = vmatprep.subr.mxu1 %v858_v0 }
  0x5f   :  { %vm1048_vm15 = vcmp.lt.f32.partialorder %v687_v38, 8388608.0  ;;  %v692_v50 = vand.u32 2147483648, %v977_v42  ;;  %v695_v51 = vand.u32 2147483647, %v979_v43  ;;  %v670_v52 = vsel %vm1015_vm12, %v669_v45, %v969_v34  ;;  %621 = vmatpush3.msra.mxu1 %v428_v33 }
  0x60   :  { %v677_v53 = vor.u32 %v676_v25, %v675_v46  ;;  %v690_v54 = vcvt.s32.f32 %v689_v47  ;;  %v697_v55 = vcvt.f32.s32 %v979_v43  ;;  %v683_v56 = vand.u32 2147483647, %v682_v48  ;;  %622 = vmatprep.subr.mxu1 %v858_v0 }
  0x61   :  { %vm1060_vm2 = vcmp.lt.f32.partialorder %v695_v51, 8388608.0  ;;  %v700_v58 = vand.u32 2147483648, %v979_v43  ;;  %v125_v59 = vmax.f32 %v646_v23, -128.0  ;;  %v126_v63 = vmax.f32 %v654_v29, -128.0  ;;  %623 = vmatpush3.msra.mxu1 %v427_v60 }
  0x62   :  { %v678_v34 = vsel %vm1025_vm13, %v677_v53, %v973_v40  ;;  %v691_v61 = vand.u32 2147483647, %v690_v54  ;;  %v698_v62 = vcvt.s32.f32 %v697_v55  ;;  %v685_v1 = vor.u32 %v684_v37, %v683_v56  ;;  %624 = vmatprep.subr.mxu1 %v858_v0 }
  0x63   :  { %v127_v2 = vmax.f32 %v662_v44, -128.0  ;;  %v128_v3 = vmax.f32 %v670_v52, -128.0  ;;  %v129_v4 = vmax.f32 %v678_v34, -128.0  ;;  %v133_v8 = vmin.f32 %v125_v59, 127.0  ;;  %625 = vmatpush3.msra.mxu1 %v426_v5 }
  0x64   :  { %v693_v6 = vor.u32 %v692_v50, %v691_v61  ;;  %v699_v7 = vand.u32 2147483647, %v698_v62  ;;  %v134_v9 = vmin.f32 %v126_v63, 127.0  ;;  %v686_v40 = vsel %vm1035_vm14, %v685_v1, %v975_v41  ;;  %626 = vmatprep.subr.mxu1 %v858_v0  ;;  %v424_v41 = vld [vmem:[#allocation10 + $0x18] sm:$0xff] }
  0x65   :  { %v135_v10 = vmin.f32 %v127_v2, 127.0  ;;  %v136_v11 = vmin.f32 %v128_v3, 127.0  ;;  %v137_v12 = vmin.f32 %v129_v4, 127.0  ;;  %v130_v16 = vmax.f32 %v686_v40, -128.0  ;;  %627 = vmatpush3.msra.mxu1 %v425_v13 }
  0x66   :  { %v694_v14 = vsel %vm1048_vm15, %v693_v6, %v977_v42  ;;  %v701_v15 = vor.u32 %v700_v58, %v699_v7  ;;  %v141_v17 = vmul.f32 0.02, %v133_v8  ;;  %v142_v19 = vmul.f32 0.02, %v134_v9  ;;  %628 = vmatprep.subr.mxu1 %v858_v0 }
  0x67   :  { %v131_v18 = vmax.f32 %v694_v14, -128.0  ;;  %v143_v20 = vmul.f32 0.02, %v135_v10  ;;  %v138_v23 = vmin.f32 %v130_v16, 127.0  ;;  %v144_v24 = vmul.f32 0.02, %v136_v11  ;;  %629 = vmatpush3.msra.mxu1 %v424_v41 }
  0x68   :  { %v702_v21 = vsel %vm1060_vm2, %v701_v15, %v979_v43  ;;  %v145_v25 = vmul.f32 0.02, %v137_v12  ;;  %v165_v27 = vsel %vm164_vm0, %v141_v17, 0.0  ;;  %v172_v28 = vsel %vm164_vm0, %v142_v19, 0.0  ;;  %630 = vmatprep.subr.mxu1 %v858_v0 }
  0x69   :  { %v132_v26 = vmax.f32 %v702_v21, -128.0  ;;  %v139_v42 = vmin.f32 %v131_v18, 127.0  ;;  %v146_v29 = vmul.f32 0.02, %v138_v23  ;;  %v166_v30 = vrot.slane %v165_v27, 4 }
  0x6a   :  { %v173_v31 = vrot.slane %v172_v28, 4  ;;  %v179_v35 = vsel %vm164_vm0, %v143_v20, 0.0  ;;  %v186_v37 = vsel %vm164_vm0, %v144_v24, 0.0  ;;  %v193_v44 = vsel %vm164_vm0, %v145_v25, 0.0 }
  0x6b   :  { %v140_v22 = vmin.f32 %v132_v26, 127.0  ;;  %v147_v43 = vmul.f32 0.02, %v139_v42  ;;  %v180_v36 = vrot.slane %v179_v35, 4  ;;  %v167_v38 = vadd.f32 %v166_v30, %v165_v27 }
  0x6c   :  { %v174_v39 = vadd.f32 %v173_v31, %v172_v28  ;;  %v187_v32 = vrot.slane %v186_v37, 4  ;;  %v194_v47 = vrot.slane %v193_v44, 4  ;;  %v200_v48 = vsel %vm164_vm0, %v146_v29, 0.0 }
  0x6d   :  { %v148_v45 = vmul.f32 0.02, %v140_v22  ;;  %v181_v46 = vadd.f32 %v180_v36, %v179_v35  ;;  %v168_v49 = vrot.slane %v167_v38, 2  ;;  %v201_v33 = vrot.slane %v200_v48, 4  ;;  %v423_v36 = vld [vmem:[#allocation10 + $0x10] sm:$0xff] }
  0x6e   :  { %v175_v50 = vrot.slane %v174_v39, 2  ;;  %v188_v51 = vadd.f32 %v187_v32, %v186_v37  ;;  %v195_v53 = vadd.f32 %v194_v47, %v193_v44  ;;  %v207_v54 = vsel %vm164_vm0, %v147_v43, 0.0  ;;  %631 = vmatpush3.msra.mxu1 %v423_v36  ;;  %v422_v37 = vld [vmem:[#allocation10 + $0x8] sm:$0xff]  ;;  %v534_v47 = vld [vmem:[%s1118_s6] ss:$0 sm:$0xff] }
  0x6f   :  { %v182_v52 = vrot.slane %v181_v46, 2  ;;  %v214_v55 = vsel %vm164_vm0, %v148_v45, 0.0  ;;  %v169_v56 = vadd.f32 %v168_v49, %v167_v38  ;;  %v202_v59 = vadd.f32 %v201_v33, %v200_v48  ;;  %632 = vmatprep.subr.mxu1 %v858_v0  ;;  %v421_v38 = vld [vmem:[#allocation10] sm:$0xff] }
  0x70   :  { %v176_v57 = vadd.f32 %v175_v50, %v174_v39  ;;  %v189_v58 = vrot.slane %v188_v51, 2  ;;  %v196_v34 = vrot.slane %v195_v53, 2  ;;  %v208_v61 = vrot.slane %v207_v54, 4  ;;  %633 = vmatpush3.msra.mxu1 %v422_v37  ;;  %v532_v39 = vld [vmem:[%s1116_s4] ss:$0 sm:$0xff] }
  0x71   :  { %v183_v60 = vadd.f32 %v182_v52, %v181_v46  ;;  %v215_v62 = vrot.slane %v214_v55, 4  ;;  %v170_v63 = vrot.slane %v169_v56, 1  ;;  %v203_v3 = vrot.slane %v202_v59, 2  ;;  %634 = vmatprep.subr.mxu1 %v858_v0 }
  0x72   :  { %v177_v1 = vrot.slane %v176_v57, 1  ;;  %v190_v2 = vadd.f32 %v189_v58, %v188_v51  ;;  %v197_v5 = vadd.f32 %v196_v34, %v195_v53  ;;  %v209_v6 = vadd.f32 %v208_v61, %v207_v54  ;;  %635 = vmatpush3.msra.mxu1 %v421_v38 }
  0x73   :  { %v184_v4 = vrot.slane %v183_v60, 1  ;;  %v216_v7 = vadd.f32 %v215_v62, %v214_v55  ;;  %v171_v8 = vadd.f32 %v170_v63, %v169_v56  ;;  %v204_v10 = vadd.f32 %v203_v3, %v202_v59 }
  0x74   :  { %v178_v9 = vadd.f32 %v177_v1, %v176_v57  ;;  %v191_v40 = vrot.slane %v190_v2, 1  ;;  %v198_v12 = vrot.slane %v197_v5, 1  ;;  %v210_v13 = vrot.slane %v209_v6, 2 }
  0x75   :  { %v185_v11 = vadd.f32 %v184_v4, %v183_v60  ;;  %v217_v14 = vrot.slane %v216_v7, 2  ;;  %v205_v16 = vrot.slane %v204_v10, 1  ;;  %vm861_vm9 = vmmov 0  }
  0x76   :  { %v192_v15 = vadd.f32 %v191_v40, %v190_v2  ;;  %v286_v17 = vsel %vm285_vm1, %v178_v9, %v171_v8  ;;  %v199_v18 = vadd.f32 %v198_v12, %v197_v5  ;;  %v211_v19 = vadd.f32 %v210_v13, %v209_v6  ;;  %601 = vmatprep.mubr.msk.f32.mxu0 %vm861_vm9, %v858_v0 }
  0x77   :  { %v218_v20 = vadd.f32 %v217_v14, %v216_v7  ;;  %v288_v41 = vsel %vm287_vm3, %v185_v11, %v286_v17  ;;  %v206_v21 = vadd.f32 %v205_v16, %v204_v10  ;;  %636 = vmatprep.mubr.msk.f32.mxu1 %vm861_vm9, %v858_v0  ;;  %vm323_vm1 = vcmask 523264  }
  0x78   :  { %v290_v23 = vsel %vm289_vm4, %v192_v15, %v288_v41  ;;  %v212_v24 = vrot.slane %v211_v19, 1  ;;  %vm325_vm3 = vcmask 785408  }
  0x79   :  { %v219_v25 = vrot.slane %v218_v20, 1  ;;  %v292_v26 = vsel %vm291_vm5, %v199_v18, %v290_v23 }
  0x7a   :  { %v294_v42 = vsel %vm293_vm6, %v206_v21, %v292_v26  ;;  %v213_v27 = vadd.f32 %v212_v24, %v211_v19 }
  0x7b   :  { %v220_v28 = vadd.f32 %v219_v25, %v218_v20 }
  0x7c   :  { %v296_v29 = vsel %vm295_vm7, %v213_v27, %v294_v42 }
  0x7d   :  { %v298_v30 = vsel %vm297_vm8, %v220_v28, %v296_v29 }
  0xc1   :  { %v302_v31 = vpop.permute.xlu0 %301 }
  0xc2   :  { %v322_v35 = vsel %vm164_vm0, %v298_v30, %v302_v31 }
  0xcb   :  { %v320_v22 = vpop.permute.xlu0 %319 }
  0xcc   :  { %v324_v43 = vsel %vm323_vm1, %v322_v35, %v320_v22 }
  0xcd   :  { %602 = vmatmul.mubr.msk.f32.vlgmr.msra.gmra.mxu0 %vm325_vm3, %v324_v43 }
 0x18d   :  { %v416_v32 = vpop.f32.mrf.mxu0 }
 0x18e   :  { %v417_v44 = vadd.f32 %v532_v39, %v416_v32 }
 0x18f   :  { %v603_v45 = vpop.f32.mrf.mxu0 }
 0x190   :  { %v420_v46 = vmax.f32 %v417_v44, 0.0 }
 0x192   :  { %637 = vmatmul.mubr.f32.vlgmr.msra.gmra.mxu1 %v420_v46 }
 0x252   :  { %v510_v48 = vpop.f32.mrf.mxu1 }
 0x253   :  { %v511_v49 = vadd.f32 %v534_v47, %v510_v48 }
 0x254   :  { %v638_v0 = vpop.f32.mrf.mxu1 }
 0x255   :  { %514 = vst [vmem:[#allocation11] sm:$0xff] %v511_v49 }
 0x256   :  { %834 = shalt.err (!%p831_p1)
}
 0x257   :  { %524 = dma.vmem_to_hbm [thread:$0]  %s522_s30, 128, %s1119_s7, [#allocation4]  }
 0x258   :  { %849 = dma.done.wait [#allocation4], 128  }
 0x259   :  { %850 = vsyncadd [#allocation4], 4294967168 }
 0x25a   :  { %528 = vsyncpa [#allocation3], 1 }
 0x25b   :  { %529 = vsyncpa [#allocation6], 1 }
 0x25c   :  { %530 = vsyncpa [#allocation9], 1 }
 0x25d   :  { %531 = vsyncpa [#allocation4], 1 }

</bundles_post_ra>
